<compile_context>
chip_gen: v7x
topology: tpu7x:2x2x1
jax: 0.10.0
libtpu: 0.0.40
codegen_flags: <defaults>
</compile_context>

<pallas_src>
import functools

import jax
import jax.numpy as jnp
from jax.experimental import pallas as pl
from jax.experimental.pallas import tpu as pltpu


def _lrelu(h):
    # nn.LeakyReLU default negative_slope = 0.01
    return jnp.where(h > 0, h, 0.01 * h)


def _round_up(n, m):
    return ((n + m - 1) // m) * m


def gated_kernel(x_ref,
                 w1_ref, b1_ref,
                 w2_ref, b2_ref,
                 w3_ref, b3_ref,
                 wf_ref, bf_ref,
                 g_ref, *, m_chunk):
    # Weights are bf16 (MXU-native); biases are f32 and the accumulate /
    # bias-add / LeakyReLU stay in f32 on the VPU.
    w1 = w1_ref[...]
    w2 = w2_ref[...]
    w3 = w3_ref[...]
    wf = wf_ref[...]
    b1 = b1_ref[...]
    b2 = b2_ref[...]
    b3 = b3_ref[...]
    bf = bf_ref[...]

    bt = x_ref.shape[0]
    # Statically-unrolled sub-chunks of the batch rows: lets the VPU work of
    # chunk i overlap the next chunk's vmatmul pushes instead of alternating
    # whole-tile MXU / VPU phases.
    for c in range(bt // m_chunk):
        r0 = c * m_chunk
        x = x_ref[pl.ds(r0, m_chunk), :]                                  # bf16
        h = _lrelu(jnp.dot(x, w1, preferred_element_type=jnp.float32) + b1)
        h = _lrelu(jnp.dot(h.astype(jnp.bfloat16), w2,
                           preferred_element_type=jnp.float32) + b2)
        h = _lrelu(jnp.dot(h.astype(jnp.bfloat16), w3,
                           preferred_element_type=jnp.float32) + b3)
        # Fused gate heads: one (128, 2) matmul.  The (m_chunk, 2) store is
        # the only lane-sparse traffic; keep it tiny rather than padding.
        g_ref[pl.ds(r0, m_chunk), :] = (
            jnp.dot(h.astype(jnp.bfloat16), wf,
                    preferred_element_type=jnp.float32) + bf)


def init_params(key):
    """Deterministic param init. Weights stored as (in, out) so the kernel
    computes x @ W + b (equivalent to PyTorch's x @ W.T + b)."""
    dims = [(512, 256), (256, 512), (512, 128), (128, 1), (128, 1)]
    params = []
    for (fan_in, fan_out) in dims:
        key, kw, kb = jax.random.split(key, 3)
        bound = 1.0 / jnp.sqrt(fan_in)
        w = jax.random.uniform(kw, (fan_in, fan_out), jnp.float32, -bound, bound)
        b = jax.random.uniform(kb, (1, fan_out), jnp.float32, -bound, bound)
        params.append((w, b))
    return params


def gated_layer(x, params, *, block_b=1024):
    """x: (B, 512) f32 -> (gate1, gate2), each (B, 1, 1, 1) f32.

    Matmuls run on the MXU in bf16 with f32 accumulation.  In a real model the
    bf16 weight casts below would be done once at load time, not per call.
    """
    B = x.shape[0]
    (w1, b1), (w2, b2), (w3, b3), (wf1, bf1), (wf2, bf2) = params

    # Fuse the two 128->1 gate heads: (128, 2) weight, (1, 2) bias.
    wf = jnp.concatenate([wf1, wf2], axis=1)
    bf = jnp.concatenate([bf1, bf2], axis=1)

    # bf16 MXU operands; biases stay f32.
    xb = x.astype(jnp.bfloat16)
    w1b = w1.astype(jnp.bfloat16)
    w2b = w2.astype(jnp.bfloat16)
    w3b = w3.astype(jnp.bfloat16)
    wfb = wf.astype(jnp.bfloat16)

    # Balanced batch tiling:
    #  * n_tiles ~ cdiv(B, block_b), but >= 2 once B >= 256 so v7x's second
    #    TensorCore gets work on the "parallel" grid axis.
    #  * Bt rounded up to 16 (bf16 sublane packing is (16, 128)).
    #  * Bt derived from cdiv(B, n_tiles) keeps padding below one sublane
    #    group per tile instead of nearly doubling when B = block_b + eps.
    n_tiles = max(1, pl.cdiv(B, block_b))
    if B >= 256:
        n_tiles = max(n_tiles, 2)
    Bt = _round_up(pl.cdiv(B, n_tiles), 16)
    n_tiles = pl.cdiv(B, Bt)
    Bp = n_tiles * Bt
    if Bp != B:
        xb = jnp.pad(xb, ((0, Bp - B), (0, 0)))

    # In-kernel M sub-chunk (MXU/VPU interleave) only for big, 256-aligned
    # tiles; odd-sized boundary tiles just run as one chunk.
    m_chunk = 256 if (Bt > 256 and Bt % 256 == 0) else Bt

    def param_spec(p):
        # Constant block index -> parameter DMA'd once, resident in VMEM
        # across all grid steps.
        return pl.BlockSpec(p.shape, lambda i: (0,) * p.ndim)

    flops_per_row = 2 * (512 * 256 + 256 * 512 + 512 * 128 + 128 * 2)
    param_bytes = (2 * (w1b.size + w2b.size + w3b.size + wfb.size)
                   + 4 * (b1.size + b2.size + b3.size + bf.size))
    cost = pl.CostEstimate(
        flops=flops_per_row * Bp,
        transcendentals=0,
        bytes_accessed=2 * Bp * 512 + param_bytes + 4 * Bp * 2,
    )

    g = pl.pallas_call(
        functools.partial(gated_kernel, m_chunk=m_chunk),
        out_shape=jax.ShapeDtypeStruct((Bp, 2), jnp.float32),
        grid=(n_tiles,),
        in_specs=[
            pl.BlockSpec((Bt, 512), lambda i: (i, 0)),   # x: tiled over batch
            param_spec(w1b), param_spec(b1),
            param_spec(w2b), param_spec(b2),
            param_spec(w3b), param_spec(b3),
            param_spec(wfb), param_spec(bf),
        ],
        out_specs=pl.BlockSpec((Bt, 2), lambda i: (i, 0)),
        compiler_params=pltpu.CompilerParams(
            dimension_semantics=("parallel",),
            vmem_limit_bytes=32 * 1024 * 1024,
        ),
        cost_estimate=cost,
    )(xb, w1b, b1, w2b, b2, w3b, b3, wfb, bf)

    g = g[:B]
    # glue: view(-1, 1, 1, 1)
    gate1 = g[:, 0:1].reshape(B, 1, 1, 1)
    gate2 = g[:, 1:2].reshape(B, 1, 1, 1)
    return gate1, gate2


def gated_layer_ref(x, params):
    """Pure-JAX reference using the same bf16-matmul / f32-accumulate recipe
    as the kernel (MXU-native precision)."""
    (w1, b1), (w2, b2), (w3, b3), (wf1, bf1), (wf2, bf2) = params

    def mm(a, w):
        return jnp.dot(a.astype(jnp.bfloat16), w.astype(jnp.bfloat16),
                       preferred_element_type=jnp.float32)

    h = _lrelu(mm(x, w1) + b1)
    h = _lrelu(mm(h, w2) + b2)
    h = _lrelu(mm(h, w3) + b3)
    g1 = (mm(h, wf1) + bf1).reshape(-1, 1, 1, 1)
    g2 = (mm(h, wf2) + bf2).reshape(-1, 1, 1, 1)
    return g1, g2


if __name__ == "__main__":
    key = jax.random.PRNGKey(0)
    key, kx = jax.random.split(key)
    B = 8
    x = jax.random.normal(kx, (B, 512), jnp.float32)
    params = init_params(key)

    g1, g2 = gated_layer(x, params)
    jax.block_until_ready((g1, g2))

    r1, r2 = gated_layer_ref(x, params)
    assert g1.shape == (B, 1, 1, 1) and g2.shape == (B, 1, 1, 1)
    assert jnp.allclose(g1, r1, atol=1e-2, rtol=1e-2), float(jnp.max(jnp.abs(g1 - r1)))
    assert jnp.allclose(g2, r2, atol=1e-2, rtol=1e-2), float(jnp.max(jnp.abs(g2 - r2)))

    print("KERNEL_OK")
</pallas_src>

<mosaic_0001>
module attributes {stable_mosaic.version = 11 : i64} {
  func.func @gated_kernel(%arg0: i32, %arg1: memref<16x512xbf16, #tpu.memory_space<vmem>>, %arg2: memref<512x256xbf16, #tpu.memory_space<vmem>>, %arg3: memref<1x256xf32, #tpu.memory_space<vmem>>, %arg4: memref<256x512xbf16, #tpu.memory_space<vmem>>, %arg5: memref<1x512xf32, #tpu.memory_space<vmem>>, %arg6: memref<512x128xbf16, #tpu.memory_space<vmem>>, %arg7: memref<1x128xf32, #tpu.memory_space<vmem>>, %arg8: memref<128x2xbf16, #tpu.memory_space<vmem>>, %arg9: memref<1x2xf32, #tpu.memory_space<vmem>>, %arg10: memref<16x2xf32, #tpu.memory_space<vmem>>) attributes {dimension_semantics = [#tpu.dimension_semantics<parallel>], iteration_bounds = array<i64: 1>, scalar_prefetch = 0 : i64, scratch_operands = 0 : i64, tpu.core_type = #tpu.core_type<tc>, window_params = [{transform_indices = @transform_0, window_bounds = array<i64: 16, 512>}, {pipeline_mode = #tpu.pipeline_mode<synchronous>, transform_indices = @transform_1, window_bounds = array<i64: 512, 256>}, {pipeline_mode = #tpu.pipeline_mode<synchronous>, transform_indices = @transform_2, window_bounds = array<i64: 1, 256>}, {pipeline_mode = #tpu.pipeline_mode<synchronous>, transform_indices = @transform_3, window_bounds = array<i64: 256, 512>}, {pipeline_mode = #tpu.pipeline_mode<synchronous>, transform_indices = @transform_4, window_bounds = array<i64: 1, 512>}, {pipeline_mode = #tpu.pipeline_mode<synchronous>, transform_indices = @transform_5, window_bounds = array<i64: 512, 128>}, {pipeline_mode = #tpu.pipeline_mode<synchronous>, transform_indices = @transform_6, window_bounds = array<i64: 1, 128>}, {pipeline_mode = #tpu.pipeline_mode<synchronous>, transform_indices = @transform_7, window_bounds = array<i64: 128, 2>}, {pipeline_mode = #tpu.pipeline_mode<synchronous>, transform_indices = @transform_8, window_bounds = array<i64: 1, 2>}, {transform_indices = @transform_9, window_bounds = array<i64: 16, 2>}]} {
    %c0 = arith.constant 0 : index
    %c0_0 = arith.constant 0 : index
    %0 = vector.load %arg2[%c0, %c0_0] : memref<512x256xbf16, #tpu.memory_space<vmem>>, vector<512x256xbf16>
    %c0_1 = arith.constant 0 : index
    %c0_2 = arith.constant 0 : index
    %1 = vector.load %arg4[%c0_1, %c0_2] : memref<256x512xbf16, #tpu.memory_space<vmem>>, vector<256x512xbf16>
    %c0_3 = arith.constant 0 : index
    %c0_4 = arith.constant 0 : index
    %2 = vector.load %arg6[%c0_3, %c0_4] : memref<512x128xbf16, #tpu.memory_space<vmem>>, vector<512x128xbf16>
    %c0_5 = arith.constant 0 : index
    %c0_6 = arith.constant 0 : index
    %3 = vector.load %arg8[%c0_5, %c0_6] : memref<128x2xbf16, #tpu.memory_space<vmem>>, vector<128x2xbf16>
    %c0_7 = arith.constant 0 : index
    %c0_8 = arith.constant 0 : index
    %4 = vector.load %arg3[%c0_7, %c0_8] : memref<1x256xf32, #tpu.memory_space<vmem>>, vector<1x256xf32>
    %c0_9 = arith.constant 0 : index
    %c0_10 = arith.constant 0 : index
    %5 = vector.load %arg5[%c0_9, %c0_10] : memref<1x512xf32, #tpu.memory_space<vmem>>, vector<1x512xf32>
    %c0_11 = arith.constant 0 : index
    %c0_12 = arith.constant 0 : index
    %6 = vector.load %arg7[%c0_11, %c0_12] : memref<1x128xf32, #tpu.memory_space<vmem>>, vector<1x128xf32>
    %c0_13 = arith.constant 0 : index
    %c0_14 = arith.constant 0 : index
    %7 = vector.load %arg9[%c0_13, %c0_14] : memref<1x2xf32, #tpu.memory_space<vmem>>, vector<1x2xf32>
    %c0_15 = arith.constant 0 : index
    %c0_16 = arith.constant 0 : index
    %8 = vector.load %arg1[%c0_15, %c0_16] : memref<16x512xbf16, #tpu.memory_space<vmem>>, vector<16x512xbf16>
    %cst = arith.constant dense<0.000000e+00> : vector<16x256xf32>
    %9 = tpu.matmul %8, %0, %cst {dimension_numbers = #tpu.dot_dimension_numbers<[1], [0], [0], [1], [0, 0, 1, 1], [], []>} : vector<16x512xbf16>, vector<512x256xbf16>, vector<16x256xf32> -> vector<16x256xf32>
    %10 = vector.broadcast %4 : vector<1x256xf32> to vector<16x256xf32>
    %11 = arith.addf %9, %10 : vector<16x256xf32>
    %cst_17 = arith.constant 0.000000e+00 : f32
    %12 = vector.broadcast %cst_17 : f32 to vector<16x256xf32>
    %13 = arith.cmpf ogt, %11, %12 : vector<16x256xf32>
    %cst_18 = arith.constant 0.00999999977 : f32
    %14 = vector.broadcast %cst_18 : f32 to vector<16x256xf32>
    %15 = arith.mulf %14, %11 : vector<16x256xf32>
    %16 = arith.select %13, %11, %15 : vector<16x256xi1>, vector<16x256xf32>
    %17 = arith.truncf %16 : vector<16x256xf32> to vector<16x256xbf16>
    %cst_19 = arith.constant dense<0.000000e+00> : vector<16x512xf32>
    %18 = tpu.matmul %17, %1, %cst_19 {dimension_numbers = #tpu.dot_dimension_numbers<[1], [0], [0], [1], [0, 0, 1, 1], [], []>} : vector<16x256xbf16>, vector<256x512xbf16>, vector<16x512xf32> -> vector<16x512xf32>
    %19 = vector.broadcast %5 : vector<1x512xf32> to vector<16x512xf32>
    %20 = arith.addf %18, %19 : vector<16x512xf32>
    %cst_20 = arith.constant 0.000000e+00 : f32
    %21 = vector.broadcast %cst_20 : f32 to vector<16x512xf32>
    %22 = arith.cmpf ogt, %20, %21 : vector<16x512xf32>
    %cst_21 = arith.constant 0.00999999977 : f32
    %23 = vector.broadcast %cst_21 : f32 to vector<16x512xf32>
    %24 = arith.mulf %23, %20 : vector<16x512xf32>
    %25 = arith.select %22, %20, %24 : vector<16x512xi1>, vector<16x512xf32>
    %26 = arith.truncf %25 : vector<16x512xf32> to vector<16x512xbf16>
    %cst_22 = arith.constant dense<0.000000e+00> : vector<16x128xf32>
    %27 = tpu.matmul %26, %2, %cst_22 {dimension_numbers = #tpu.dot_dimension_numbers<[1], [0], [0], [1], [0, 0, 1, 1], [], []>} : vector<16x512xbf16>, vector<512x128xbf16>, vector<16x128xf32> -> vector<16x128xf32>
    %28 = vector.broadcast %6 : vector<1x128xf32> to vector<16x128xf32>
    %29 = arith.addf %27, %28 : vector<16x128xf32>
    %cst_23 = arith.constant 0.000000e+00 : f32
    %30 = vector.broadcast %cst_23 : f32 to vector<16x128xf32>
    %31 = arith.cmpf ogt, %29, %30 : vector<16x128xf32>
    %cst_24 = arith.constant 0.00999999977 : f32
    %32 = vector.broadcast %cst_24 : f32 to vector<16x128xf32>
    %33 = arith.mulf %32, %29 : vector<16x128xf32>
    %34 = arith.select %31, %29, %33 : vector<16x128xi1>, vector<16x128xf32>
    %35 = arith.truncf %34 : vector<16x128xf32> to vector<16x128xbf16>
    %cst_25 = arith.constant dense<0.000000e+00> : vector<16x2xf32>
    %36 = tpu.matmul %35, %3, %cst_25 {dimension_numbers = #tpu.dot_dimension_numbers<[1], [0], [0], [1], [0, 0, 1, 1], [], []>} : vector<16x128xbf16>, vector<128x2xbf16>, vector<16x2xf32> -> vector<16x2xf32>
    %37 = vector.broadcast %7 : vector<1x2xf32> to vector<16x2xf32>
    %38 = arith.addf %36, %37 : vector<16x2xf32>
    %c0_26 = arith.constant 0 : index
    %c0_27 = arith.constant 0 : index
    %39 = vector.load %arg10[%c0_26, %c0_27] : memref<16x2xf32, #tpu.memory_space<vmem>>, vector<16x2xf32>
    tpu.vector_store %arg10[%c0_26, %c0_27], %38 {strides = array<i32>} : memref<16x2xf32, #tpu.memory_space<vmem>>, vector<16x2xf32>,
    return
  }
  func.func @transform_0(%arg0: i32) -> (i32, i32) {
    %c0_i32 = arith.constant 0 : i32
    %c0_i32_0 = arith.constant 0 : i32
    return %arg0, %c0_i32 : i32, i32
  }
  func.func @transform_1(%arg0: i32) -> (i32, i32) {
    %c0_i32 = arith.constant 0 : i32
    %c0_i32_0 = arith.constant 0 : i32
    %c0_i32_1 = arith.constant 0 : i32
    return %c0_i32, %c0_i32_0 : i32, i32
  }
  func.func @transform_2(%arg0: i32) -> (i32, i32) {
    %c0_i32 = arith.constant 0 : i32
    %c0_i32_0 = arith.constant 0 : i32
    %c0_i32_1 = arith.constant 0 : i32
    return %c0_i32, %c0_i32_0 : i32, i32
  }
  func.func @transform_3(%arg0: i32) -> (i32, i32) {
    %c0_i32 = arith.constant 0 : i32
    %c0_i32_0 = arith.constant 0 : i32
    %c0_i32_1 = arith.constant 0 : i32
    return %c0_i32, %c0_i32_0 : i32, i32
  }
  func.func @transform_4(%arg0: i32) -> (i32, i32) {
    %c0_i32 = arith.constant 0 : i32
    %c0_i32_0 = arith.constant 0 : i32
    %c0_i32_1 = arith.constant 0 : i32
    return %c0_i32, %c0_i32_0 : i32, i32
  }
  func.func @transform_5(%arg0: i32) -> (i32, i32) {
    %c0_i32 = arith.constant 0 : i32
    %c0_i32_0 = arith.constant 0 : i32
    %c0_i32_1 = arith.constant 0 : i32
    return %c0_i32, %c0_i32_0 : i32, i32
  }
  func.func @transform_6(%arg0: i32) -> (i32, i32) {
    %c0_i32 = arith.constant 0 : i32
    %c0_i32_0 = arith.constant 0 : i32
    %c0_i32_1 = arith.constant 0 : i32
    return %c0_i32, %c0_i32_0 : i32, i32
  }
  func.func @transform_7(%arg0: i32) -> (i32, i32) {
    %c0_i32 = arith.constant 0 : i32
    %c0_i32_0 = arith.constant 0 : i32
    %c0_i32_1 = arith.constant 0 : i32
    return %c0_i32, %c0_i32_0 : i32, i32
  }
  func.func @transform_8(%arg0: i32) -> (i32, i32) {
    %c0_i32 = arith.constant 0 : i32
    %c0_i32_0 = arith.constant 0 : i32
    %c0_i32_1 = arith.constant 0 : i32
    return %c0_i32, %c0_i32_0 : i32, i32
  }
  func.func @transform_9(%arg0: i32) -> (i32, i32) {
    %c0_i32 = arith.constant 0 : i32
    %c0_i32_0 = arith.constant 0 : i32
    return %arg0, %c0_i32 : i32, i32
  }
}

</mosaic_0001>

<bundles_post_ra>
// kernel: tpu_custom_call.1
= control target key start
LH: loop header
LB: loop body
LE: loop exit
PB: predicated region body
PF: predicated region fallthrough
CT: control target
= control target key end

     0   :  { %14 = vsyncpa [#allocation3], 0  ;;  %s2330_s0 = inlined_call_operand.vmem [shape: bf16[16,512], index: 0, kind: input, shape index: {}]   ;;  %s2331_s1 = inlined_call_operand.hbm [shape: bf16[512,256], index: 1, kind: input, shape index: {}]   ;;  %s2332_s2 = inlined_call_operand.vmem [shape: f32[1,256], index: 2, kind: input, shape index: {}]   ;;  %s2333_s3 = inlined_call_operand.hbm [shape: bf16[256,512], index: 3, kind: input, shape index: {}]   ;;  %s2334_s4 = inlined_call_operand.vmem [shape: f32[1,512], index: 4, kind: input, shape index: {}]   ;;  %s2335_s5 = inlined_call_operand.hbm [shape: bf16[512,128], index: 5, kind: input, shape index: {}]   ;;  %s2336_s6 = inlined_call_operand.vmem [shape: f32[1,128], index: 6, kind: input, shape index: {}]   ;;  %s2337_s7 = inlined_call_operand.vmem [shape: bf16[128,2], index: 7, kind: input, shape index: {}]   ;;  %s2338_s8 = inlined_call_operand.vmem [shape: f32[1,2], index: 8, kind: input, shape index: {}]   ;;  %s2339_s9 = inlined_call_operand.vmem [shape: f32[16,2], index: 9, kind: output, shape index: {}]  }
   0x1   :  { %15 = vsyncpa [#allocation5], 0  ;;  %s2161_s30 = smov [#allocation4]   ;;  %s2091_s13 = scalar_lea.hbm %s2333_s3, 8192 }
   0x2   :  { %s37_s10 = sshll.u32 %s2161_s30, 4  ;;  %p2092_p0 = scmp.ne.s32.totalorder %s2333_s3, %s2091_s13  ;;  %s38_s10 = int_to_ptr.vmem [resolvable:$true] %s37_s10 }
   0x3   :  { %p2095_p1 = scmp.lt.u32.totalorder %s2091_s13, %s2333_s3 }
   0x5   :  { %p2097_p2 = pnand %p2095_p1, %p2092_p0 }
   0x7   :  { %2100 = shalt.err (!%p2097_p2)
}
   0x8   :  { %s2101_s18 = scalar_lea.vmem %s38_s10, 8192  ;;  %p2106_p4 = scmp.lt.s32.totalorder %s38_s10, %s38_s10 }
   0x9   :  { %p2102_p3 = scmp.ne.s32.totalorder %s38_s10, %s2101_s18  ;;  %p2107_p5 = scmp.lt.s32.totalorder %s2101_s18, %s2101_s18 }
   0xb   :  { %p2108_p6 = por %p2107_p5, %p2106_p4 }
   0xd   :  { %p2109_p7 = pnand %p2108_p6, %p2102_p3 }
   0xf   :  { %2112 = shalt.err (!%p2109_p7)
}
  0x10   :  { %s2162_s19 = smov 256   ;;  %s2163_s20 = smov 16  }
  0x11   :  { %43 = dma.hbm_to_vmem [thread:$0]  %s2333_s3, 8192, %s38_s10, [#allocation5], %s2162_s19, %s2162_s19, %s2163_s20  }
  0x12   :  { %s2164_s23 = smov [#allocation2]   ;;  %s2113_s27 = scalar_lea.hbm %s2331_s1, 8192 }
  0x13   :  { %s23_s24 = sshll.u32 %s2164_s23, 4  ;;  %p2114_p8 = scmp.ne.s32.totalorder %s2331_s1, %s2113_s27  ;;  %s24_s24 = int_to_ptr.vmem [resolvable:$true] %s23_s24 }
  0x14   :  { %p2117_p9 = scmp.lt.u32.totalorder %s2113_s27, %s2331_s1 }
  0x16   :  { %p2119_p10 = pnand %p2117_p9, %p2114_p8 }
  0x18   :  { %2122 = shalt.err (!%p2119_p10)
}
  0x19   :  { %s2123_s12 = scalar_lea.vmem %s24_s24, 8192  ;;  %p2128_p12 = scmp.lt.s32.totalorder %s24_s24, %s24_s24 }
  0x1a   :  { %p2124_p11 = scmp.ne.s32.totalorder %s24_s24, %s2123_s12  ;;  %p2129_p13 = scmp.lt.s32.totalorder %s2123_s12, %s2123_s12 }
  0x1c   :  { %p2130_p0 = por %p2129_p13, %p2128_p12 }
  0x1e   :  { %p2131_p1 = pnand %p2130_p0, %p2124_p11 }
  0x20   :  { %2134 = shalt.err (!%p2131_p1)
}
  0x21   :  { %s2165_s3 = smov 128   ;;  %s2166_s10 = smov 8  }
  0x22   :  { %29 = dma.hbm_to_vmem [thread:$0]  %s2331_s1, 8192, %s24_s24, [#allocation3], %s2165_s3, %s2165_s3, %s2166_s10  }
  0x23   :  { %s2167_s15 = smov [#allocation6]   ;;  %s2135_s19 = scalar_lea.hbm %s2335_s5, 4096 }
  0x24   :  { %s51_s16 = sshll.u32 %s2167_s15, 4  ;;  %p2136_p2 = scmp.ne.s32.totalorder %s2335_s5, %s2135_s19  ;;  %s52_s16 = int_to_ptr.vmem [resolvable:$true] %s51_s16 }
  0x25   :  { %p2139_p3 = scmp.lt.u32.totalorder %s2135_s19, %s2335_s5 }
  0x27   :  { %p2141_p4 = pnand %p2139_p3, %p2136_p2 }
  0x29   :  { %2144 = shalt.err (!%p2141_p4)
}
  0x2a   :  { %s2145_s25 = scalar_lea.vmem %s52_s16, 4096  ;;  %p2150_p6 = scmp.lt.s32.totalorder %s52_s16, %s52_s16 }
  0x2b   :  { %p2146_p5 = scmp.ne.s32.totalorder %s52_s16, %s2145_s25  ;;  %p2151_p7 = scmp.lt.s32.totalorder %s2145_s25, %s2145_s25 }
  0x2d   :  { %p2152_p8 = por %p2151_p7, %p2150_p6 }
  0x2f   :  { %p2153_p9 = pnand %p2152_p8, %p2146_p5 }
  0x31   :  { %2156 = shalt.err (!%p2153_p9)
}
  0x32   :  { %s2168_s1 = smov 64   ;;  %s2169_s24 = smov 4  }
  0x33   :  { %57 = dma.hbm_to_vmem [thread:$0]  %s2335_s5, 4096, %s52_s16, [#allocation5], %s2168_s1, %s2168_s1, %s2169_s24  }
  0x34   :  { %2157 = dma.done.wait [#allocation3], 8192  }
  0x35   :  { %2158 = vsyncadd [#allocation3], 4294959104 }
  0x36   :  { %2159 = dma.done.wait [#allocation5], 12288  }
  0x37   :  { %2160 = vsyncadd [#allocation5], 4294955008  ;;  %v1853_v0 = vld [vmem:[#allocation2 + $0x4] ss:$8 sps:$4 sm:$0xff]   ;;  %v1855_v1 = vld [vmem:[#allocation2] ss:$8 sps:$4 sm:$0xff]  }
  0x38   :  { %641 = vmatprep.subr.bf16.mxu0 %v1853_v0  ;;  %v1856_v2 = vld [vmem:[#allocation2 + $0x14] ss:$8 sps:$4 sm:$0xff]   ;;  %v1858_v3 = vld [vmem:[#allocation2 + $0x10] ss:$8 sps:$4 sm:$0xff]   ;;  %v1859_v4 = vld [vmem:[#allocation2 + $0x24] ss:$8 sps:$4 sm:$0xff]  }
  0x39   :  { %642 = vmatpush1.bf16.msra.mxu0 %v1855_v1  ;;  %v1861_v5 = vld [vmem:[#allocation2 + $0x20] ss:$8 sps:$4 sm:$0xff]   ;;  %v1862_v6 = vld [vmem:[#allocation2 + $0x34] ss:$8 sps:$4 sm:$0xff]   ;;  %v1864_v7 = vld [vmem:[#allocation2 + $0x30] ss:$8 sps:$4 sm:$0xff]  }
  0x3a   :  { %643 = vmatprep.subr.bf16.mxu0 %v1856_v2  ;;  %v1865_v8 = vld [vmem:[#allocation2 + $0x44] ss:$8 sps:$4 sm:$0xff]   ;;  %v1867_v9 = vld [vmem:[#allocation2 + $0x40] ss:$8 sps:$4 sm:$0xff]   ;;  %v1868_v10 = vld [vmem:[#allocation2 + $0x54] ss:$8 sps:$4 sm:$0xff]  }
  0x3b   :  { %v1870_v11 = vld [vmem:[#allocation2 + $0x50] ss:$8 sps:$4 sm:$0xff]   ;;  %v1871_v12 = vld [vmem:[#allocation2 + $0x64] ss:$8 sps:$4 sm:$0xff]   ;;  %v1873_v14 = vld [vmem:[#allocation2 + $0x60] ss:$8 sps:$4 sm:$0xff]  }
  0x3c   :  { %v1903_v13 = vld [vmem:[%s2330_s0 + $0x4] ss:$16 sps:$4 sm:$0xff]   ;;  %v1876_v16 = vld [vmem:[#allocation2 + $0x70] ss:$8 sps:$4 sm:$0xff]   ;;  %v1879_v18 = vld [vmem:[#allocation2 + $0x80] ss:$8 sps:$4 sm:$0xff]  }
  0x3d   :  { %644 = vmatpush1.bf16.msra.mxu0 %v1858_v3  ;;  %v1874_v15 = vld [vmem:[#allocation2 + $0x74] ss:$8 sps:$4 sm:$0xff]   ;;  %673 = vmatprep.mubr.bf16.mxu0 %v1903_v13  ;;  %v1877_v17 = vld [vmem:[#allocation2 + $0x84] ss:$8 sps:$4 sm:$0xff]   ;;  %v1882_v20 = vld [vmem:[#allocation2 + $0x90] ss:$8 sps:$4 sm:$0xff]  }
  0x3e   :  { %645 = vmatprep.subr.bf16.mxu0 %v1859_v4  ;;  %v1880_v19 = vld [vmem:[#allocation2 + $0x94] ss:$8 sps:$4 sm:$0xff]   ;;  %v1883_v21 = vld [vmem:[#allocation2 + $0xa4] ss:$8 sps:$4 sm:$0xff]   ;;  %v1885_v22 = vld [vmem:[#allocation2 + $0xa0] ss:$8 sps:$4 sm:$0xff]  }
  0x3f   :  { %v1886_v23 = vld [vmem:[#allocation2 + $0xb4] ss:$8 sps:$4 sm:$0xff]   ;;  %v1888_v24 = vld [vmem:[#allocation2 + $0xb0] ss:$8 sps:$4 sm:$0xff]   ;;  %v1889_v25 = vld [vmem:[#allocation2 + $0xc4] ss:$8 sps:$4 sm:$0xff]  }
  0x40   :  { %v1955_v26 = vld [vmem:[#allocation4 + $0x4] ss:$16 sps:$4 sm:$0xff]   ;;  %v1957_v27 = vld [vmem:[#allocation4] ss:$16 sps:$4 sm:$0xff]   ;;  %v1954_v48 = vld [vmem:[%s2330_s0 + $0xc] ss:$16 sps:$4 sm:$0xff]  }
  0x41   :  { %646 = vmatpush1.bf16.msra.mxu0 %v1861_v5  ;;  %v1891_v28 = vld [vmem:[#allocation2 + $0xc0] ss:$8 sps:$4 sm:$0xff]   ;;  %v1958_v29 = vld [vmem:[#allocation4 + $0x24] ss:$16 sps:$4 sm:$0xff]   ;;  %1082 = vmatprep.subr.bf16.mxu1 %v1955_v26  ;;  %v1894_v33 = vld [vmem:[#allocation2 + $0xd0] ss:$8 sps:$4 sm:$0xff]  }
  0x42   :  { %647 = vmatprep.subr.bf16.mxu0 %v1862_v6  ;;  %v1892_v30 = vld [vmem:[#allocation2 + $0xd4] ss:$8 sps:$4 sm:$0xff]   ;;  %1083 = vmatpush1.bf16.msra.mxu1 %v1957_v27  ;;  %v1960_v31 = vld [vmem:[#allocation4 + $0x20] ss:$16 sps:$4 sm:$0xff]   ;;  %v1895_v34 = vld [vmem:[#allocation2 + $0xe4] ss:$8 sps:$4 sm:$0xff]  }
  0x43   :  { %1084 = vmatprep.subr.bf16.mxu1 %v1958_v29  ;;  %v1961_v32 = vld [vmem:[#allocation4 + $0x44] ss:$16 sps:$4 sm:$0xff]   ;;  %v1963_v35 = vld [vmem:[#allocation4 + $0x40] ss:$16 sps:$4 sm:$0xff]   ;;  %vm2171_vm12 = vmmov 0   ;;  %vm1578_vm15 = vcmask 15360  }
  0x44   :  { %v1964_v36 = vld [vmem:[#allocation4 + $0x64] ss:$16 sps:$4 sm:$0xff]   ;;  %v1897_v37 = vld [vmem:[#allocation2 + $0xe0] ss:$8 sps:$4 sm:$0xff]   ;;  %v1900_v41 = vld [vmem:[#allocation2 + $0xf0] ss:$8 sps:$4 sm:$0xff]  }
  0x45   :  { %648 = vmatpush1.bf16.msra.mxu0 %v1864_v7  ;;  %v1898_v38 = vld [vmem:[#allocation2 + $0xf4] ss:$8 sps:$4 sm:$0xff]   ;;  %v1966_v39 = vld [vmem:[#allocation4 + $0x60] ss:$16 sps:$4 sm:$0xff]   ;;  %v1906_v43 = vld [vmem:[#allocation2 + $0x104] ss:$8 sps:$4 sm:$0xff]  }
  0x46   :  { %649 = vmatprep.subr.bf16.mxu0 %v1865_v8  ;;  %1085 = vmatpush1.bf16.msra.mxu1 %v1960_v31  ;;  %v1967_v40 = vld [vmem:[#allocation4 + $0x84] ss:$16 sps:$4 sm:$0xff]   ;;  %v1901_v42 = vld [vmem:[%s2330_s0] ss:$16 sps:$4 sm:$0xff]  }
  0x47   :  { %1086 = vmatprep.subr.bf16.mxu1 %v1961_v32  ;;  %v1904_v44 = vld [vmem:[#allocation2 + $0x100] ss:$8 sps:$4 sm:$0xff]   ;;  %v1909_v46 = vld [vmem:[#allocation2 + $0x114] ss:$8 sps:$4 sm:$0xff]   ;;  %v1907_v51 = vld [vmem:[#allocation2 + $0x110] ss:$8 sps:$4 sm:$0xff]  }
  0x48   :  { %v1969_v45 = vld [vmem:[#allocation4 + $0x80] ss:$16 sps:$4 sm:$0xff]   ;;  %v1970_v47 = vld [vmem:[#allocation4 + $0xa4] ss:$16 sps:$4 sm:$0xff]  }
  0x49   :  { %650 = vmatpush1.bf16.msra.mxu0 %v1867_v9  ;;  %v1972_v49 = vld [vmem:[#allocation4 + $0xa0] ss:$16 sps:$4 sm:$0xff]   ;;  %v1973_v50 = vld [vmem:[#allocation4 + $0xc4] ss:$16 sps:$4 sm:$0xff]  }
  0x4a   :  { %651 = vmatprep.subr.bf16.mxu0 %v1868_v10  ;;  %1087 = vmatpush1.bf16.msra.mxu1 %v1963_v35  ;;  %v1912_v52 = vld [vmem:[#allocation2 + $0x124] ss:$8 sps:$4 sm:$0xff]   ;;  %v1975_v53 = vld [vmem:[#allocation4 + $0xc0] ss:$16 sps:$4 sm:$0xff]   ;;  %v1915_v56 = vld [vmem:[#allocation2 + $0x134] ss:$8 sps:$4 sm:$0xff]  }
  0x4b   :  { %1088 = vmatprep.subr.bf16.mxu1 %v1964_v36  ;;  %v1976_v54 = vld [vmem:[#allocation4 + $0xe4] ss:$16 sps:$4 sm:$0xff]   ;;  %v1910_v55 = vld [vmem:[#allocation2 + $0x120] ss:$8 sps:$4 sm:$0xff]   ;;  %v1913_v59 = vld [vmem:[#allocation2 + $0x130] ss:$8 sps:$4 sm:$0xff]  }
  0x4c   :  { %v1978_v57 = vld [vmem:[#allocation4 + $0xe0] ss:$16 sps:$4 sm:$0xff]   ;;  %v1979_v58 = vld [vmem:[#allocation4 + $0x104] ss:$16 sps:$4 sm:$0xff]   ;;  %v2005_v36 = vld [vmem:[#allocation4 + $0xc] ss:$16 sps:$4 sm:$0xff]  }
  0x4d   :  { %652 = vmatpush1.bf16.msra.mxu0 %v1870_v11  ;;  %v1918_v60 = vld [vmem:[#allocation2 + $0x144] ss:$8 sps:$4 sm:$0xff]   ;;  %v1981_v61 = vld [vmem:[#allocation4 + $0x100] ss:$16 sps:$4 sm:$0xff]   ;;  %v1921_v0 = vld [vmem:[#allocation2 + $0x154] ss:$8 sps:$4 sm:$0xff]  }
  0x4e   :  { %653 = vmatprep.subr.bf16.mxu0 %v1871_v12  ;;  %1089 = vmatpush1.bf16.msra.mxu1 %v1966_v39  ;;  %v1982_v62 = vld [vmem:[#allocation4 + $0x124] ss:$16 sps:$4 sm:$0xff]   ;;  %v1916_v63 = vld [vmem:[#allocation2 + $0x140] ss:$8 sps:$4 sm:$0xff]   ;;  %v1919_v3 = vld [vmem:[#allocation2 + $0x150] ss:$8 sps:$4 sm:$0xff]  }
  0x4f   :  { %1090 = vmatprep.subr.bf16.mxu1 %v1967_v40  ;;  %v1984_v1 = vld [vmem:[#allocation4 + $0x120] ss:$16 sps:$4 sm:$0xff]   ;;  %v1985_v2 = vld [vmem:[#allocation4 + $0x144] ss:$16 sps:$4 sm:$0xff]   ;;  %v2053_v39 = vld [vmem:[#allocation6 + $0x48] sm:$0xff]  }
  0x50   :  { %v1924_v4 = vld [vmem:[#allocation2 + $0x164] ss:$8 sps:$4 sm:$0xff]   ;;  %v1987_v5 = vld [vmem:[#allocation4 + $0x140] ss:$16 sps:$4 sm:$0xff]   ;;  %v1927_v8 = vld [vmem:[#allocation2 + $0x174] ss:$8 sps:$4 sm:$0xff]  }
  0x51   :  { %654 = vmatpush1.bf16.msra.mxu0 %v1873_v14  ;;  %v1988_v6 = vld [vmem:[#allocation4 + $0x164] ss:$16 sps:$4 sm:$0xff]   ;;  %v1922_v7 = vld [vmem:[#allocation2 + $0x160] ss:$8 sps:$4 sm:$0xff]   ;;  %v1925_v11 = vld [vmem:[#allocation2 + $0x170] ss:$8 sps:$4 sm:$0xff]  }
  0x52   :  { %655 = vmatprep.subr.bf16.mxu0 %v1874_v15  ;;  %1091 = vmatpush1.bf16.msra.mxu1 %v1969_v45  ;;  %v1990_v9 = vld [vmem:[#allocation4 + $0x160] ss:$16 sps:$4 sm:$0xff]   ;;  %v1991_v10 = vld [vmem:[#allocation4 + $0x184] ss:$16 sps:$4 sm:$0xff]   ;;  %v2054_v40 = vld [vmem:[#allocation6 + $0x8] sm:$0xff]  }
  0x53   :  { %1092 = vmatprep.subr.bf16.mxu1 %v1970_v47  ;;  %v1930_v12 = vld [vmem:[#allocation2 + $0x184] ss:$8 sps:$4 sm:$0xff]   ;;  %v1993_v13 = vld [vmem:[#allocation4 + $0x180] ss:$16 sps:$4 sm:$0xff]   ;;  %v291_v47 = vlaneseq }
  0x54   :  { %v1994_v14 = vld [vmem:[#allocation4 + $0x1a4] ss:$16 sps:$4 sm:$0xff]   ;;  %v1928_v15 = vld [vmem:[#allocation2 + $0x180] ss:$8 sps:$4 sm:$0xff]   ;;  %v1949_v29 = vld [vmem:[#allocation2 + $0x1f0] ss:$8 sps:$4 sm:$0xff]  }
  0x55   :  { %656 = vmatpush1.bf16.msra.mxu0 %v1876_v16  ;;  %v1933_v16 = vld [vmem:[#allocation2 + $0x194] ss:$8 sps:$4 sm:$0xff]   ;;  %v1948_v26 = vld [vmem:[#allocation2 + $0x1e4] ss:$8 sps:$4 sm:$0xff]   ;;  %v1946_v27 = vld [vmem:[#allocation2 + $0x1e0] ss:$8 sps:$4 sm:$0xff]  }
  0x56   :  { %657 = vmatprep.subr.bf16.mxu0 %v1877_v17  ;;  %1093 = vmatpush1.bf16.msra.mxu1 %v1972_v49  ;;  %v1931_v17 = vld [vmem:[#allocation2 + $0x190] ss:$8 sps:$4 sm:$0xff]   ;;  %v1997_v32 = vld [vmem:[#allocation4 + $0x1c4] ss:$16 sps:$4 sm:$0xff]  }
  0x57   :  { %1094 = vmatprep.subr.bf16.mxu1 %v1973_v50  ;;  %v1996_v31 = vld [vmem:[#allocation4 + $0x1a0] ss:$16 sps:$4 sm:$0xff]  }
  0x58   :  { %v2002_v35 = vld [vmem:[#allocation4 + $0x1e0] ss:$16 sps:$4 sm:$0xff]  }
  0x59   :  { %658 = vmatpush1.bf16.msra.mxu0 %v1879_v18  ;;  %v1936_v18 = vld [vmem:[#allocation2 + $0x1a4] ss:$8 sps:$4 sm:$0xff]   ;;  %v282_v50 = vld [vmem:[%s2332_s2] sm:$0x3] }
  0x5a   :  { %659 = vmatprep.subr.bf16.mxu0 %v1880_v19  ;;  %1095 = vmatpush1.bf16.msra.mxu1 %v1975_v53  ;;  %v1934_v19 = vld [vmem:[#allocation2 + $0x1a0] ss:$8 sps:$4 sm:$0xff]  }
  0x5b   :  { %1096 = vmatprep.subr.bf16.mxu1 %v1976_v54  ;;  %v2059_v45 = vld [vmem:[#allocation6 + $0x60] sm:$0xff]  }
  0x5d   :  { %660 = vmatpush1.bf16.msra.mxu0 %v1882_v20  ;;  %v1939_v20 = vld [vmem:[#allocation2 + $0x1b4] ss:$8 sps:$4 sm:$0xff]  }
  0x5e   :  { %661 = vmatprep.subr.bf16.mxu0 %v1883_v21  ;;  %1097 = vmatpush1.bf16.msra.mxu1 %v1978_v57  ;;  %v1937_v21 = vld [vmem:[#allocation2 + $0x1b0] ss:$8 sps:$4 sm:$0xff]  }
  0x5f   :  { %1098 = vmatprep.subr.bf16.mxu1 %v1979_v58 }
  0x61   :  { %662 = vmatpush1.bf16.msra.mxu0 %v1885_v22  ;;  %v1942_v22 = vld [vmem:[#allocation2 + $0x1c4] ss:$8 sps:$4 sm:$0xff]  }
  0x62   :  { %663 = vmatprep.subr.bf16.mxu0 %v1886_v23  ;;  %1099 = vmatpush1.bf16.msra.mxu1 %v1981_v61  ;;  %v1940_v23 = vld [vmem:[#allocation2 + $0x1c0] ss:$8 sps:$4 sm:$0xff]  }
  0x63   :  { %1100 = vmatprep.subr.bf16.mxu1 %v1982_v62 }
  0x65   :  { %664 = vmatpush1.bf16.msra.mxu0 %v1888_v24  ;;  %v1945_v24 = vld [vmem:[#allocation2 + $0x1d4] ss:$8 sps:$4 sm:$0xff]  }
  0x66   :  { %665 = vmatprep.subr.bf16.mxu0 %v1889_v25  ;;  %1101 = vmatpush1.bf16.msra.mxu1 %v1984_v1  ;;  %v1943_v25 = vld [vmem:[#allocation2 + $0x1d0] ss:$8 sps:$4 sm:$0xff]  }
  0x67   :  { %1102 = vmatprep.subr.bf16.mxu1 %v1985_v2 }
  0x69   :  { %666 = vmatpush1.bf16.msra.mxu0 %v1891_v28  ;;  %v1951_v28 = vld [vmem:[#allocation2 + $0x1f4] ss:$8 sps:$4 sm:$0xff]  }
  0x6a   :  { %667 = vmatprep.subr.bf16.mxu0 %v1892_v30  ;;  %1103 = vmatpush1.bf16.msra.mxu1 %v1987_v5  ;;  %v1952_v30 = vld [vmem:[%s2330_s0 + $0x8] ss:$16 sps:$4 sm:$0xff]  }
  0x6b   :  { %1104 = vmatprep.subr.bf16.mxu1 %v1988_v6 }
  0x6d   :  { %668 = vmatpush1.bf16.msra.mxu0 %v1894_v33  ;;  %v1999_v33 = vld [vmem:[#allocation4 + $0x1c0] ss:$16 sps:$4 sm:$0xff]  }
  0x6e   :  { %669 = vmatprep.subr.bf16.mxu0 %v1895_v34  ;;  %1105 = vmatpush1.bf16.msra.mxu1 %v1990_v9  ;;  %v2000_v34 = vld [vmem:[#allocation4 + $0x1e4] ss:$16 sps:$4 sm:$0xff]   ;;  %v2008_v9 = vld [vmem:[#allocation4 + $0x2c] ss:$16 sps:$4 sm:$0xff]  }
  0x6f   :  { %1106 = vmatprep.subr.bf16.mxu1 %v1991_v10  ;;  %v2006_v10 = vld [vmem:[#allocation4 + $0x28] ss:$16 sps:$4 sm:$0xff]  }
  0x71   :  { %670 = vmatpush1.bf16.msra.mxu0 %v1897_v37  ;;  %v2051_v37 = vld [vmem:[#allocation6 + $0x40] sm:$0xff]  }
  0x72   :  { %671 = vmatprep.subr.bf16.mxu0 %v1898_v38  ;;  %1107 = vmatpush1.bf16.msra.mxu1 %v1993_v13  ;;  %v2052_v38 = vld [vmem:[#allocation6] sm:$0xff]   ;;  %v2014_v13 = vld [vmem:[#allocation4 + $0x6c] ss:$16 sps:$4 sm:$0xff]  }
  0x73   :  { %1108 = vmatprep.subr.bf16.mxu1 %v1994_v14  ;;  %v2012_v14 = vld [vmem:[#allocation4 + $0x68] ss:$16 sps:$4 sm:$0xff]  }
  0x75   :  { %672 = vmatpush1.bf16.msra.mxu0 %v1900_v41  ;;  %v2055_v41 = vld [vmem:[#allocation6 + $0x50] sm:$0xff]  }
  0x76   :  { %684 = vmatprep.subr.bf16.mxu0 %v1906_v43  ;;  %1109 = vmatpush1.bf16.msra.mxu1 %v1996_v31  ;;  %v2057_v43 = vld [vmem:[#allocation6 + $0x58] sm:$0xff]  }
  0x77   :  { %1110 = vmatprep.subr.bf16.mxu1 %v1997_v32  ;;  %v2041_v31 = vld [vmem:[#allocation4 + $0x18c] ss:$16 sps:$4 sm:$0xff]   ;;  %v2039_v32 = vld [vmem:[#allocation4 + $0x188] ss:$16 sps:$4 sm:$0xff]  }
  0x78   :  { %674 = vmatmul.mubr.bf16.vlgmr.msra.gmra.mrb[0].mxu0 %v1901_v42  ;;  %v2056_v42 = vld [vmem:[#allocation6 + $0x10] sm:$0xff]  }
  0x79   :  { %685 = vmatpush1.bf16.msra.mxu0 %v1904_v44  ;;  %716 = vmatprep.mubr.bf16.mxu0 %v1954_v48  ;;  %v2058_v44 = vld [vmem:[#allocation6 + $0x18] sm:$0xff]   ;;  %v2270_v48 = vshrl.u32 %v291_v47, 7  ;;  %v2069_v47 = vld [vmem:[#allocation6 + $0xc8] sm:$0xff]  }
  0x7a   :  { %686 = vmatprep.subr.bf16.mxu0 %v1909_v46  ;;  %1111 = vmatpush1.bf16.msra.mxu1 %v1999_v33  ;;  %v2060_v46 = vld [vmem:[#allocation6 + $0x20] sm:$0xff]   ;;  %v2044_v33 = vld [vmem:[#allocation4 + $0x1ac] ss:$16 sps:$4 sm:$0xff]  }
  0x7b   :  { %1112 = vmatprep.subr.bf16.mxu1 %v2000_v34  ;;  %v293_v49 = vsub.s32 0, %v2270_v48  ;;  %v2042_v34 = vld [vmem:[#allocation4 + $0x1a8] ss:$16 sps:$4 sm:$0xff]  }
  0x7d   :  { %687 = vmatpush1.bf16.msra.mxu0 %v1907_v51  ;;  %v297_v51 = vsub.s32 1, %v2270_v48 }
  0x7e   :  { %688 = vmatprep.subr.bf16.mxu0 %v1912_v52  ;;  %1113 = vmatpush1.bf16.msra.mxu1 %v2002_v35  ;;  %v294_v52 = vrot.slane %v282_v50, %v293_v49  ;;  %v2047_v35 = vld [vmem:[#allocation4 + $0x1cc] ss:$16 sps:$4 sm:$0xff]  }
  0x7f   :  { %1125 = vmatprep.subr.bf16.mxu1 %v2005_v36  ;;  %v298_v53 = vrot.slane %v282_v50, %v297_v51  ;;  %v2045_v36 = vld [vmem:[#allocation4 + $0x1c8] ss:$16 sps:$4 sm:$0xff]  }
  0x80   :  { %v2070_v50 = vld [vmem:[#allocation6 + $0x88] sm:$0xff]  }
  0x81   :  { %689 = vmatpush1.bf16.msra.mxu0 %v1910_v55 }
  0x82   :  { %690 = vmatprep.subr.bf16.mxu0 %v1915_v56 }
  0x85   :  { %691 = vmatpush1.bf16.msra.mxu0 %v1913_v59 }
  0x86   :  { %692 = vmatprep.subr.bf16.mxu0 %v1918_v60 }
  0x89   :  { %693 = vmatpush1.bf16.msra.mxu0 %v1916_v63 }
  0x8a   :  { %694 = vmatprep.subr.bf16.mxu0 %v1921_v0 }
  0x8d   :  { %695 = vmatpush1.bf16.msra.mxu0 %v1919_v3 }
  0x8e   :  { %696 = vmatprep.subr.bf16.mxu0 %v1924_v4 }
  0x91   :  { %697 = vmatpush1.bf16.msra.mxu0 %v1922_v7 }
  0x92   :  { %698 = vmatprep.subr.bf16.mxu0 %v1927_v8  ;;  %v2003_v8 = vld [vmem:[#allocation4 + $0x8] ss:$16 sps:$4 sm:$0xff]  }
  0x95   :  { %699 = vmatpush1.bf16.msra.mxu0 %v1925_v11  ;;  %v2011_v11 = vld [vmem:[#allocation4 + $0x4c] ss:$16 sps:$4 sm:$0xff]  }
  0x96   :  { %700 = vmatprep.subr.bf16.mxu0 %v1930_v12  ;;  %v2009_v12 = vld [vmem:[#allocation4 + $0x48] ss:$16 sps:$4 sm:$0xff]  }
  0x99   :  { %701 = vmatpush1.bf16.msra.mxu0 %v1928_v15  ;;  %v2017_v15 = vld [vmem:[#allocation4 + $0x8c] ss:$16 sps:$4 sm:$0xff]  }
  0x9a   :  { %702 = vmatprep.subr.bf16.mxu0 %v1933_v16  ;;  %v2015_v16 = vld [vmem:[#allocation4 + $0x88] ss:$16 sps:$4 sm:$0xff]  }
  0x9d   :  { %703 = vmatpush1.bf16.msra.mxu0 %v1931_v17  ;;  %v2020_v17 = vld [vmem:[#allocation4 + $0xac] ss:$16 sps:$4 sm:$0xff]  }
  0x9e   :  { %704 = vmatprep.subr.bf16.mxu0 %v1936_v18  ;;  %v2018_v18 = vld [vmem:[#allocation4 + $0xa8] ss:$16 sps:$4 sm:$0xff]  }
  0xa1   :  { %705 = vmatpush1.bf16.msra.mxu0 %v1934_v19  ;;  %v2023_v19 = vld [vmem:[#allocation4 + $0xcc] ss:$16 sps:$4 sm:$0xff]  }
  0xa2   :  { %706 = vmatprep.subr.bf16.mxu0 %v1939_v20  ;;  %v2021_v20 = vld [vmem:[#allocation4 + $0xc8] ss:$16 sps:$4 sm:$0xff]  }
  0xa5   :  { %707 = vmatpush1.bf16.msra.mxu0 %v1937_v21  ;;  %v2026_v21 = vld [vmem:[#allocation4 + $0xec] ss:$16 sps:$4 sm:$0xff]  }
  0xa6   :  { %708 = vmatprep.subr.bf16.mxu0 %v1942_v22  ;;  %v2024_v22 = vld [vmem:[#allocation4 + $0xe8] ss:$16 sps:$4 sm:$0xff]  }
  0xa9   :  { %709 = vmatpush1.bf16.msra.mxu0 %v1940_v23  ;;  %v2029_v23 = vld [vmem:[#allocation4 + $0x10c] ss:$16 sps:$4 sm:$0xff]  }
  0xaa   :  { %710 = vmatprep.subr.bf16.mxu0 %v1945_v24  ;;  %v2027_v24 = vld [vmem:[#allocation4 + $0x108] ss:$16 sps:$4 sm:$0xff]  }
  0xad   :  { %711 = vmatpush1.bf16.msra.mxu0 %v1943_v25  ;;  %v2032_v25 = vld [vmem:[#allocation4 + $0x12c] ss:$16 sps:$4 sm:$0xff]  }
  0xae   :  { %712 = vmatprep.subr.bf16.mxu0 %v1948_v26  ;;  %v2030_v26 = vld [vmem:[#allocation4 + $0x128] ss:$16 sps:$4 sm:$0xff]  }
  0xb1   :  { %713 = vmatpush1.bf16.msra.mxu0 %v1946_v27  ;;  %v2035_v27 = vld [vmem:[#allocation4 + $0x14c] ss:$16 sps:$4 sm:$0xff]  }
  0xb2   :  { %714 = vmatprep.subr.bf16.mxu0 %v1951_v28  ;;  %v2033_v28 = vld [vmem:[#allocation4 + $0x148] ss:$16 sps:$4 sm:$0xff]  }
  0xb5   :  { %715 = vmatpush1.bf16.msra.mxu0 %v1949_v29  ;;  %v2038_v29 = vld [vmem:[#allocation4 + $0x16c] ss:$16 sps:$4 sm:$0xff]  }
  0xb6   :  { %1761 = vmatprep.subr.bf16.mxu0 %v2051_v37  ;;  %v2050_v37 = vld [vmem:[#allocation4 + $0x1ec] ss:$16 sps:$4 sm:$0xff]  }
  0xb8   :  { %717 = vmatmul.mubr.bf16.vlgmr.msra.gmra.mrb[0].mxu0 %v1952_v30  ;;  %v2036_v30 = vld [vmem:[#allocation4 + $0x168] ss:$16 sps:$4 sm:$0xff]  }
  0xb9   :  { %1762 = vmatpush3.bf16.msra.mxu0 %v2052_v38  ;;  %v2048_v38 = vld [vmem:[#allocation4 + $0x1e8] ss:$16 sps:$4 sm:$0xff]  }
  0xba   :  { %1763 = vmatprep.subr.bf16.mxu0 %v2053_v39  ;;  %v2061_v39 = vld [vmem:[#allocation6 + $0x68] sm:$0xff]  }
  0xbd   :  { %1764 = vmatpush3.bf16.msra.mxu0 %v2054_v40  ;;  %v2062_v40 = vld [vmem:[#allocation6 + $0x28] sm:$0xff]  }
  0xbe   :  { %1765 = vmatprep.subr.bf16.mxu0 %v2055_v41  ;;  %v2063_v41 = vld [vmem:[#allocation6 + $0x70] sm:$0xff]  }
  0xc1   :  { %1766 = vmatpush3.bf16.msra.mxu0 %v2056_v42  ;;  %v2064_v42 = vld [vmem:[#allocation6 + $0x30] sm:$0xff]  }
  0xc2   :  { %1767 = vmatprep.subr.bf16.mxu0 %v2057_v43  ;;  %v2065_v43 = vld [vmem:[#allocation6 + $0x78] sm:$0xff]  }
  0xc5   :  { %1768 = vmatpush3.bf16.msra.mxu0 %v2058_v44  ;;  %v2066_v44 = vld [vmem:[#allocation6 + $0x38] sm:$0xff]  }
  0xc6   :  { %1769 = vmatprep.subr.bf16.mxu0 %v2059_v45  ;;  %v2067_v45 = vld [vmem:[#allocation6 + $0xc0] sm:$0xff]  }
  0xc9   :  { %1770 = vmatpush3.bf16.msra.mxu0 %v2060_v46  ;;  %v2068_v46 = vld [vmem:[#allocation6 + $0x80] sm:$0xff]  }
  0xca   :  { %1771 = vmatprep.subr.bf16.mxu0 %v2061_v39 }
  0xcd   :  { %1772 = vmatpush3.bf16.msra.mxu0 %v2062_v40  ;;  %v2083_v40 = vld [vmem:[%s2337_s7] sm:$0xff]  }
  0xce   :  { %1773 = vmatprep.subr.bf16.mxu0 %v2063_v41  ;;  %v2170_v41 = vmov 0.0  }
  0xd1   :  { %1774 = vmatpush3.bf16.msra.mxu0 %v2064_v42  ;;  %v2084_v42 = vld [vmem:[%s2337_s7 + $0x8] sm:$0xff]  }
  0xd2   :  { %1775 = vmatprep.subr.bf16.mxu0 %v2065_v43  ;;  %v2085_v43 = vld [vmem:[%s2337_s7 + $0x10] sm:$0xff]  }
  0xd5   :  { %1776 = vmatpush3.bf16.msra.mxu0 %v2066_v44  ;;  %v2086_v44 = vld [vmem:[%s2337_s7 + $0x18] sm:$0xff]  }
  0xd6   :  { %1814 = vmatprep.subr.bf16.mxu0 %v2170_v41 }
 0x18b   :  { %v718_v54 = vpop.f32.mrb[0].mxu0 }
 0x18c   :  { %v1834_v55 = vadd.f32 %v718_v54, %v294_v52  ;;  %v720_v56 = vpop.f32.mrb[1].mxu0  ;;  %v2073_v54 = vld [vmem:[#allocation6 + $0xd8] sm:$0xff]  }
 0x18d   :  { %v1835_v57 = vadd.f32 %v720_v56, %v298_v53  ;;  %v722_v58 = vpop.f32.mrb[2].mxu0  ;;  %v2075_v56 = vld [vmem:[#allocation6 + $0xe0] sm:$0xff]  }
 0x18e   :  { %v731_v59 = vmul.f32 0.01, %v1834_v55  ;;  %v1836_v60 = vadd.f32 %v722_v58, %v294_v52  ;;  %v724_v61 = vpop.f32.mrb[3].mxu0  ;;  %vm727_vm0 = vcmp.gt.f32.partialorder %v1834_v55, 0.0  ;;  %v2071_v52 = vld [vmem:[#allocation6 + $0xd0] sm:$0xff]   ;;  %v2077_v58 = vld [vmem:[#allocation6 + $0xe8] sm:$0xff]  }
 0x18f   :  { %v732_v62 = vmul.f32 0.01, %v1835_v57  ;;  %v1837_v63 = vadd.f32 %v724_v61, %v298_v53  ;;  %vm728_vm2 = vcmp.gt.f32.partialorder %v1835_v57, 0.0  ;;  %v2072_v53 = vld [vmem:[#allocation6 + $0x90] sm:$0xff]  }
 0x190   :  { %vm729_vm1 = vcmp.gt.f32.partialorder %v1836_v60, 0.0  ;;  %v733_v0 = vmul.f32 0.01, %v1836_v60  ;;  %v735_v2 = vsel %vm727_vm0, %v1834_v55, %v731_v59  ;;  %v2074_v55 = vld [vmem:[#allocation6 + $0x98] sm:$0xff]   ;;  %v2078_v59 = vld [vmem:[#allocation6 + $0xa8] sm:$0xff]   ;;  %v2080_v61 = vld [vmem:[#allocation6 + $0xb0] sm:$0xff]  }
 0x191   :  { %v734_v1 = vmul.f32 0.01, %v1837_v63  ;;  %vm730_vm3 = vcmp.gt.f32.partialorder %v1837_v63, 0.0  ;;  %v736_v4 = vsel %vm728_vm2, %v1835_v57, %v732_v62  ;;  %v2076_v57 = vld [vmem:[#allocation6 + $0xa0] sm:$0xff]   ;;  %v2081_v62 = vld [vmem:[#allocation6 + $0xf8] sm:$0xff]  }
 0x192   :  { %v737_v3 = vsel %vm729_vm1, %v1836_v60, %v733_v0  ;;  %v2079_v60 = vld [vmem:[#allocation6 + $0xf0] sm:$0xff]   ;;  %v283_v0 = vld [vmem:[%s2334_s4] sm:$0xf] }
 0x193   :  { %v738_v5 = vsel %vm730_vm3, %v1837_v63, %v734_v1  ;;  %v2281_v6 = vpack.c.bf16 %v737_v3, %v735_v2  ;;  %v2082_v63 = vld [vmem:[#allocation6 + $0xb8] sm:$0xff]   ;;  %v745_v1 = vrot.slane %v283_v0, %v293_v49  ;;  %v749_v2 = vrot.slane %v283_v0, %v297_v51 }
 0x194   :  { %v740_v7 = vpack.c.bf16 %v738_v5, %v736_v4 }
 0x196   :  { %1114 = vmatprep.mubr.bf16.mxu1 %v740_v7 }
 0x197   :  { %1115 = vmatmul.mubr.bf16.vlgmr.msra.gmra.mrb[0].mxu1 %v2281_v6 }
 0x198   :  { %1126 = vmatpush1.bf16.msra.mxu1 %v2003_v8  ;;  %1157 = vmatprep.mubr.bf16.mxu1 %v740_v7 }
 0x199   :  { %1127 = vmatprep.subr.bf16.mxu1 %v2008_v9 }
 0x19c   :  { %1128 = vmatpush1.bf16.msra.mxu1 %v2006_v10 }
 0x19d   :  { %1129 = vmatprep.subr.bf16.mxu1 %v2011_v11 }
 0x1a0   :  { %1130 = vmatpush1.bf16.msra.mxu1 %v2009_v12 }
 0x1a1   :  { %1131 = vmatprep.subr.bf16.mxu1 %v2014_v13 }
 0x1a4   :  { %1132 = vmatpush1.bf16.msra.mxu1 %v2012_v14 }
 0x1a5   :  { %1133 = vmatprep.subr.bf16.mxu1 %v2017_v15 }
 0x1a8   :  { %1134 = vmatpush1.bf16.msra.mxu1 %v2015_v16 }
 0x1a9   :  { %1135 = vmatprep.subr.bf16.mxu1 %v2020_v17 }
 0x1ac   :  { %1136 = vmatpush1.bf16.msra.mxu1 %v2018_v18 }
 0x1ad   :  { %1137 = vmatprep.subr.bf16.mxu1 %v2023_v19  ;;  %v752_v19 = vsub.s32 2, %v2270_v48 }
 0x1b0   :  { %1138 = vmatpush1.bf16.msra.mxu1 %v2021_v20  ;;  %v756_v20 = vsub.s32 3, %v2270_v48 }
 0x1b1   :  { %1139 = vmatprep.subr.bf16.mxu1 %v2026_v21  ;;  %v753_v21 = vrot.slane %v283_v0, %v752_v19 }
 0x1b4   :  { %1140 = vmatpush1.bf16.msra.mxu1 %v2024_v22  ;;  %v757_v22 = vrot.slane %v283_v0, %v756_v20 }
 0x1b5   :  { %1141 = vmatprep.subr.bf16.mxu1 %v2029_v23 }
 0x1b8   :  { %1142 = vmatpush1.bf16.msra.mxu1 %v2027_v24 }
 0x1b9   :  { %1143 = vmatprep.subr.bf16.mxu1 %v2032_v25 }
 0x1bc   :  { %1144 = vmatpush1.bf16.msra.mxu1 %v2030_v26 }
 0x1bd   :  { %1145 = vmatprep.subr.bf16.mxu1 %v2035_v27 }
 0x1c0   :  { %1146 = vmatpush1.bf16.msra.mxu1 %v2033_v28 }
 0x1c1   :  { %1147 = vmatprep.subr.bf16.mxu1 %v2038_v29 }
 0x1c4   :  { %1148 = vmatpush1.bf16.msra.mxu1 %v2036_v30 }
 0x1c5   :  { %1149 = vmatprep.subr.bf16.mxu1 %v2041_v31 }
 0x1c8   :  { %1150 = vmatpush1.bf16.msra.mxu1 %v2039_v32 }
 0x1c9   :  { %1151 = vmatprep.subr.bf16.mxu1 %v2044_v33 }
 0x1cc   :  { %1152 = vmatpush1.bf16.msra.mxu1 %v2042_v34 }
 0x1cd   :  { %1153 = vmatprep.subr.bf16.mxu1 %v2047_v35 }
 0x1d0   :  { %1154 = vmatpush1.bf16.msra.mxu1 %v2045_v36 }
 0x1d1   :  { %1155 = vmatprep.subr.bf16.mxu1 %v2050_v37 }
 0x1d4   :  { %1156 = vmatpush1.bf16.msra.mxu1 %v2048_v38 }
 0x1d5   :  { %1783 = vmatprep.subr.bf16.mxu1 %v2067_v45  ;;  %v2087_v45 = vld [vmem:[%s2337_s7 + $0x20] sm:$0xff]  }
 0x1d7   :  { %1158 = vmatmul.mubr.bf16.vlgmr.msra.gmra.mrb[4].mxu1 %v2281_v6 }
 0x1d8   :  { %1784 = vmatpush3.bf16.msra.mxu1 %v2068_v46  ;;  %v2088_v46 = vld [vmem:[%s2337_s7 + $0x28] sm:$0xff]  }
 0x1d9   :  { %1785 = vmatprep.subr.bf16.mxu1 %v2069_v47  ;;  %v2089_v47 = vld [vmem:[%s2337_s7 + $0x30] sm:$0xff]  }
 0x1dc   :  { %1786 = vmatpush3.bf16.msra.mxu1 %v2070_v50  ;;  %v2090_v50 = vld [vmem:[%s2337_s7 + $0x38] sm:$0xff]  }
 0x1dd   :  { %1787 = vmatprep.subr.bf16.mxu1 %v2071_v52 }
 0x1e0   :  { %1788 = vmatpush3.bf16.msra.mxu1 %v2072_v53 }
 0x1e1   :  { %1789 = vmatprep.subr.bf16.mxu1 %v2073_v54 }
 0x1e4   :  { %1790 = vmatpush3.bf16.msra.mxu1 %v2074_v55 }
 0x1e5   :  { %1791 = vmatprep.subr.bf16.mxu1 %v2075_v56 }
 0x1e8   :  { %1792 = vmatpush3.bf16.msra.mxu1 %v2076_v57 }
 0x1e9   :  { %1793 = vmatprep.subr.bf16.mxu1 %v2077_v58  ;;  %v1719_v58 = vld [vmem:[%s2336_s6] ss:$0 sm:$0xff] }
 0x1ec   :  { %1794 = vmatpush3.bf16.msra.mxu1 %v2078_v59 }
 0x1ed   :  { %1795 = vmatprep.subr.bf16.mxu1 %v2079_v60 }
 0x1f0   :  { %1796 = vmatpush3.bf16.msra.mxu1 %v2080_v61 }
 0x1f1   :  { %1797 = vmatprep.subr.bf16.mxu1 %v2081_v62 }
 0x1f4   :  { %1798 = vmatpush3.bf16.msra.mxu1 %v2082_v63 }
 0x26a   :  { %v1116_v3 = vpop.f32.mrb[0].mxu1 }
 0x26b   :  { %v1117_v4 = vadd.f32 %v1116_v3, %v745_v1  ;;  %v1118_v5 = vpop.f32.mrb[1].mxu1 }
 0x26c   :  { %v1119_v6 = vadd.f32 %v1118_v5, %v749_v2  ;;  %v1120_v7 = vpop.f32.mrb[2].mxu1 }
 0x26d   :  { %v1176_v8 = vmul.f32 0.01, %v1117_v4  ;;  %v1121_v9 = vadd.f32 %v1120_v7, %v745_v1  ;;  %v1122_v10 = vpop.f32.mrb[3].mxu1  ;;  %vm1168_vm4 = vcmp.gt.f32.partialorder %v1117_v4, 0.0 }
 0x26e   :  { %v1177_v11 = vmul.f32 0.01, %v1119_v6  ;;  %v1123_v12 = vadd.f32 %v1122_v10, %v749_v2  ;;  %vm1169_vm5 = vcmp.gt.f32.partialorder %v1119_v6, 0.0  ;;  %v1752_v10 = vld [vmem:[%s2338_s8] ss:$0 sm:$0xff] }
 0x26f   :  { %vm1172_vm6 = vcmp.gt.f32.partialorder %v1121_v9, 0.0  ;;  %v1180_v13 = vmul.f32 0.01, %v1121_v9  ;;  %v1184_v49 = vsel %vm1168_vm4, %v1117_v4, %v1176_v8 }
 0x270   :  { %vm1173_vm7 = vcmp.gt.f32.partialorder %v1123_v12, 0.0  ;;  %v1181_v14 = vmul.f32 0.01, %v1123_v12  ;;  %v1185_v51 = vsel %vm1169_vm5, %v1119_v6, %v1177_v11 }
 0x271   :  { %v1188_v15 = vsel %vm1172_vm6, %v1121_v9, %v1180_v13 }
 0x272   :  { %v1192_v16 = vpack.c.bf16 %v1188_v15, %v1184_v49  ;;  %v1189_v17 = vsel %vm1173_vm7, %v1123_v12, %v1181_v14 }
 0x273   :  { %v1193_v18 = vpack.c.bf16 %v1189_v17, %v1185_v51 }
 0x275   :  { %1426 = vmatprep.mubr.bf16.mxu0 %v1193_v18 }
 0x276   :  { %1427 = vmatmul.mubr.bf16.vlgmr.msra.gmra.mrb[4].mxu0 %v1192_v16 }
 0x277   :  { %1815 = vmatpush3.bf16.msra.mxu0 %v2083_v40  ;;  %1830 = vmatprep.mubr.msk.bf16.mxu0 %vm2171_vm12, %v2170_v41 }
 0x278   :  { %1816 = vmatprep.subr.bf16.mxu0 %v2170_v41 }
 0x27b   :  { %1817 = vmatpush3.bf16.msra.mxu0 %v2084_v42 }
 0x27c   :  { %1818 = vmatprep.subr.bf16.mxu0 %v2170_v41 }
 0x27f   :  { %1819 = vmatpush3.bf16.msra.mxu0 %v2085_v43 }
 0x280   :  { %1820 = vmatprep.subr.bf16.mxu0 %v2170_v41 }
 0x283   :  { %1821 = vmatpush3.bf16.msra.mxu0 %v2086_v44 }
 0x284   :  { %1822 = vmatprep.subr.bf16.mxu0 %v2170_v41 }
 0x287   :  { %1823 = vmatpush3.bf16.msra.mxu0 %v2087_v45 }
 0x288   :  { %1824 = vmatprep.subr.bf16.mxu0 %v2170_v41 }
 0x28b   :  { %1825 = vmatpush3.bf16.msra.mxu0 %v2088_v46 }
 0x28c   :  { %1826 = vmatprep.subr.bf16.mxu0 %v2170_v41 }
 0x28f   :  { %1827 = vmatpush3.bf16.msra.mxu0 %v2089_v47 }
 0x290   :  { %1828 = vmatprep.subr.bf16.mxu0 %v2170_v41 }
 0x293   :  { %1829 = vmatpush3.bf16.msra.mxu0 %v2090_v50 }
 0x2aa   :  { %v1159_v23 = vpop.f32.mrb[4].mxu1 }
 0x2ab   :  { %v1160_v24 = vadd.f32 %v1159_v23, %v753_v21  ;;  %v1161_v25 = vpop.f32.mrb[5].mxu1 }
 0x2ac   :  { %v1162_v26 = vadd.f32 %v1161_v25, %v757_v22  ;;  %v1163_v27 = vpop.f32.mrb[6].mxu1 }
 0x2ad   :  { %v1178_v28 = vmul.f32 0.01, %v1160_v24  ;;  %v1164_v29 = vadd.f32 %v1163_v27, %v753_v21  ;;  %v1165_v30 = vpop.f32.mrb[7].mxu1  ;;  %vm1170_vm8 = vcmp.gt.f32.partialorder %v1160_v24, 0.0 }
 0x2ae   :  { %v1179_v31 = vmul.f32 0.01, %v1162_v26  ;;  %v1166_v32 = vadd.f32 %v1165_v30, %v757_v22  ;;  %vm1171_vm9 = vcmp.gt.f32.partialorder %v1162_v26, 0.0 }
 0x2af   :  { %vm1174_vm10 = vcmp.gt.f32.partialorder %v1164_v29, 0.0  ;;  %v1182_v33 = vmul.f32 0.01, %v1164_v29  ;;  %v1186_v35 = vsel %vm1170_vm8, %v1160_v24, %v1178_v28 }
 0x2b0   :  { %vm1175_vm11 = vcmp.gt.f32.partialorder %v1166_v32, 0.0  ;;  %v1183_v34 = vmul.f32 0.01, %v1166_v32  ;;  %v1187_v37 = vsel %vm1171_vm9, %v1162_v26, %v1179_v31 }
 0x2b1   :  { %v1190_v48 = vsel %vm1174_vm10, %v1164_v29, %v1182_v33 }
 0x2b2   :  { %v1194_v36 = vpack.c.bf16 %v1190_v48, %v1186_v35  ;;  %v1191_v38 = vsel %vm1175_vm11, %v1166_v32, %v1183_v34 }
 0x2b3   :  { %v1195_v39 = vpack.c.bf16 %v1191_v38, %v1187_v37 }
 0x2b5   :  { %1467 = vmatprep.mubr.bf16.mxu1 %v1195_v39 }
 0x2b6   :  { %1468 = vmatmul.mubr.bf16.vlgmr.msra.gmra.mrb[8].mxu1 %v1194_v36 }
 0x349   :  { %v1777_v52 = vpop.f32.mrb[4].mxu0 }
 0x34a   :  { %v1778_v53 = vpop.f32.mrb[5].mxu0 }
 0x34b   :  { %v1779_v54 = vadd.f32 %v1778_v53, %v1777_v52  ;;  %v1780_v55 = vpop.f32.mrb[6].mxu0 }
 0x34c   :  { %v1781_v56 = vpop.f32.mrb[7].mxu0 }
 0x34d   :  { %v1782_v57 = vadd.f32 %v1781_v56, %v1780_v55  ;;  %v1429_v61 = vadd.f32 %v1779_v54, %v1719_v58 }
 0x34f   :  { %v1432_v1 = vadd.f32 %v1782_v57, %v1719_v58 }
 0x389   :  { %v1799_v59 = vpop.f32.mrb[8].mxu1 }
 0x38a   :  { %v1800_v60 = vpop.f32.mrb[9].mxu1 }
 0x38b   :  { %v1801_v62 = vadd.f32 %v1800_v60, %v1799_v59  ;;  %v1802_v63 = vpop.f32.mrb[10].mxu1 }
 0x38c   :  { %v1803_v0 = vpop.f32.mrb[11].mxu1 }
 0x38d   :  { %v1470_v2 = vadd.f32 %v1801_v62, %v1429_v61  ;;  %v1804_v3 = vadd.f32 %v1803_v0, %v1802_v63 }
 0x38f   :  { %v1478_v4 = vmul.f32 0.01, %v1470_v2  ;;  %v1473_v5 = vadd.f32 %v1804_v3, %v1432_v1  ;;  %vm1476_vm13 = vcmp.gt.f32.partialorder %v1470_v2, 0.0 }
 0x391   :  { %vm1477_vm14 = vcmp.gt.f32.partialorder %v1473_v5, 0.0  ;;  %v1479_v6 = vmul.f32 0.01, %v1473_v5  ;;  %v1480_v7 = vsel %vm1476_vm13, %v1470_v2, %v1478_v4 }
 0x393   :  { %v1481_v8 = vsel %vm1477_vm14, %v1473_v5, %v1479_v6 }
 0x394   :  { %v1482_v9 = vpack.c.bf16 %v1481_v8, %v1480_v7 }
 0x396   :  { %1831 = vmatmul.mubr.bf16.vlgmr.msra.gmra.mrb[8].mxu0 %v1482_v9 }
 0x469   :  { %v1571_v11 = vpop.f32.mrb[8].mxu0 }
 0x46a   :  { %v1572_v12 = vadd.f32 %v1752_v10, %v1571_v11  ;;  %v1832_v13 = vpop.f32.mrb[9].mxu0 }
 0x46b   :  { %v1574_v14 = vpop.f32.mrb[10].mxu0 }
 0x46c   :  { %1579 = vst.msk [vmem:[%s2339_s9] sm:$0xff] %vm1578_vm15, %v1572_v12  ;;  %v1575_v49 = vadd.f32 %v1752_v10, %v1574_v14  ;;  %v1833_v15 = vpop.f32.mrb[11].mxu0 }
 0x46e   :  { %1580 = vst.msk [vmem:[%s2339_s9 + $0x8] sm:$0xff] %vm1578_vm15, %v1575_v49 }
 0x46f   :  { %1585 = vsyncpa [#allocation3], 1 }
 0x470   :  { %1586 = vsyncpa [#allocation5], 1 }

</bundles_post_ra>
